<compile_context>
chip_gen: v7x
topology: tpu7x:2x2x1
jax: 0.10.0
libtpu: 0.0.40
codegen_flags: <defaults>
</compile_context>

<pallas_src>
import functools

import jax
import jax.numpy as jnp
from jax.experimental import pallas as pl
from jax.experimental.pallas import tpu as pltpu


def _dc_topk_kernel(x_ref, t_ref, stats_ref, ce_ref, *, C, TROWS, HAS_PAD):
    # x_ref:     (1, C, TROWS, 128)  logits, native dtype (f32 or bf16)
    # t_ref:     (1, TROWS, 128)     labels (int8 or int32); -1 marks padded pixels
    # stats_ref: (1, 3*C, 8, 128)    f32 accumulators: [tp | sum(softmax) | onehot count]
    # ce_ref:    (1, TROWS, 128)     f32 per-pixel cross-entropy (-1e30 on padded pixels)
    @pl.when(pl.program_id(1) == 0)
    def _init():
        stats_ref[...] = jnp.zeros_like(stats_ref)

    # Single upcast of the narrow label stream; comparing against f32 constants keeps
    # the masks in the same layout as the f32 data they select.
    t = t_ref[0].astype(jnp.float32)

    # class max in the logits' native dtype (bf16 stays bf16 on the VPU), upcast once
    m = x_ref[0, 0]
    for c in range(1, C):
        m = jnp.maximum(m, x_ref[0, c])
    m = m.astype(jnp.float32)

    # exp / running class sum / target-logit gather in one pass over classes
    es = []
    s = None
    x_t = jnp.zeros_like(m)
    for c in range(C):
        xc = x_ref[0, c].astype(jnp.float32)
        ec = jnp.exp(xc - m)
        es.append(ec)
        s = ec if s is None else s + ec
        # TODO(synk): this `t == c` is recomputed in the stats loop below; fusing the two
        # loops is blocked by inv_s needing the full class sum first, and caching C mask
        # planes in VMEM would cost more ld/st than the one extra compare.
        x_t = jnp.where(t == float(c), xc, x_t)

    # per-pixel CE: -log_softmax(x)[target] = logsumexp - x[target]  (underflow-safe)
    ce = jnp.log(s) + m - x_t
    if HAS_PAD:
        # padded pixels must never win the top-k selection
        ce = jnp.where(t >= 0.0, ce, -1e30)
    ce_ref[0] = ce

    # EUP approx reciprocal (slack slot) + one Newton step to restore f32 accuracy
    inv_s = pl.reciprocal(s, approx=True)
    inv_s = inv_s * (2.0 - s * inv_s)

    # dice statistics as (8,128) vreg partials (cheap VPU adds); the tiny final collapse
    # to (C,) runs in XLA.  sum(softmax) is accumulated UNMASKED: padded pixels (logits
    # exactly zero) contribute exactly 1/C per class, subtracted analytically outside.
    nsub = TROWS // 8
    for c in range(C):
        sm_c = es[c] * inv_s
        mask_f = (t == float(c)).astype(jnp.float32)
        stats_ref[0, 0 * C + c] += (mask_f * sm_c).reshape(nsub, 8, 128).sum(axis=0)
        stats_ref[0, 1 * C + c] += sm_c.reshape(nsub, 8, 128).sum(axis=0)
        stats_ref[0, 2 * C + c] += mask_f.reshape(nsub, 8, 128).sum(axis=0)


def _run_kernel(net_output, target, max_rows_per_chunk=None):
    B, C, H, W = net_output.shape
    HW = H * W
    xsize = jnp.dtype(net_output.dtype).itemsize

    rows = -(-HW // 128)                  # lanes of 128 pixels
    rows8 = -(-rows // 8) * 8             # sublane-aligned

    # Per-chunk VMEM working set (bytes per row of chunk):
    #   2x double-buffered logits block + 2x (labels + ce block) + C live f32 exp planes.
    # Budget ~20 MiB keeps headroom under the 32 MiB scoped limit (v7x: 64 MiB physical).
    budget = 20 * 1024 * 1024
    per_row = 128 * (2 * C * xsize + 2 * (4 + 4) + 4 * C)
    max_trows = max(32, min(512, (budget // per_row) // 32 * 32))
    if max_rows_per_chunk is not None:
        max_trows = max(8, min(max_trows, max_rows_per_chunk))

    if rows8 <= max_trows:
        trows, rows_pad = rows8, rows8
    else:
        # multiples of 32 (int8 label tiling); prefer zero padding, then fewer chunks
        best = None
        start = max(32, max_trows - max_trows % 32)
        for cand in range(start, 31, -32):
            rp = -(-rows // cand) * cand
            cost = rp + 8 * (rp // cand)          # padded rows + per-chunk overhead
            if best is None or cost < best[0]:
                best = (cost, cand, rp)
        _, trows, rows_pad = best
    n_chunks = rows_pad // trows
    hw_pad = rows_pad * 128
    has_pad = hw_pad > HW

    # v7x has 2 TensorCores: give megacore a second parallel unit when B alone can't.
    S = 2 if (B % 2 == 1 and n_chunks % 2 == 0) else 1
    nc2 = n_chunks // S

    # int8 labels (4x smaller HBM stream) whenever the class count / tiling allow it.
    t_dtype = jnp.int8 if (C <= 127 and trows % 32 == 0) else jnp.int32

    x = net_output.reshape(B, C, HW)               # keep native dtype through the DMA
    t = target.reshape(B, HW).astype(t_dtype)
    if has_pad:
        # padded logits are EXACTLY zero -> each padded pixel adds exactly 1/C to every
        # class's softmax sum; corrected analytically below.  (Aligned nnU-Net patch
        # sizes take the no-pad path and skip this HBM copy entirely.)
        x = jnp.pad(x, ((0, 0), (0, 0), (0, hw_pad - HW)))
        t = jnp.pad(t, ((0, 0), (0, hw_pad - HW)), constant_values=-1)
    x = x.reshape(B, C, rows_pad, 128)
    t = t.reshape(B, rows_pad, 128)

    if S == 1:
        x_map = lambda g, h: (g, 0, h, 0)
        t_map = lambda g, h: (g, h, 0)
        st_map = lambda g, h: (g, 0, 0, 0)
        ce_map = lambda g, h: (g, h, 0)
    else:
        x_map = lambda g, h: (g // S, 0, (g % S) * nc2 + h, 0)
        t_map = lambda g, h: (g // S, (g % S) * nc2 + h, 0)
        st_map = lambda g, h: (g, 0, 0, 0)
        ce_map = lambda g, h: (g // S, (g % S) * nc2 + h, 0)

    kernel = functools.partial(_dc_topk_kernel, C=C, TROWS=trows, HAS_PAD=has_pad)
    stats, ce = pl.pallas_call(
        kernel,
        grid=(B * S, nc2),
        in_specs=[
            pl.BlockSpec((1, C, trows, 128), x_map),
            pl.BlockSpec((1, trows, 128), t_map),
        ],
        out_specs=(
            pl.BlockSpec((1, 3 * C, 8, 128), st_map),
            pl.BlockSpec((1, trows, 128), ce_map),
        ),
        out_shape=(
            jax.ShapeDtypeStruct((B * S, 3 * C, 8, 128), jnp.float32),
            jax.ShapeDtypeStruct((B, rows_pad, 128), jnp.float32),
        ),
        compiler_params=pltpu.CompilerParams(
            dimension_semantics=("parallel", "arbitrary"),
            vmem_limit_bytes=32 * 1024 * 1024),
    )(x, t)

    # tiny final collapse of the vreg-shaped accumulators (runs in plain XLA)
    stats = stats.sum(axis=(-2, -1)).reshape(B, S, 3, C).sum(axis=1)   # (B, 3, C)
    tp = stats[:, 0]
    n_pad = hw_pad - HW
    fp = stats[:, 1] - (n_pad / C) - tp     # padded pixels contributed exactly 1/C each
    fn = stats[:, 2] - tp
    return tp, fp, fn, ce, HW


def dc_and_topk_loss(net_output, target, smooth=1.0, topk_percent=10.0,
                     approx_topk_recall=None, max_rows_per_chunk=None):
    """Forward pass of DC_and_topk_loss (aggregate='sum', batch_dice=False,
    do_bg=True, square=False, TopKLoss default k=10)."""
    tp, fp, fn, ce_map, HW = _run_kernel(net_output, target, max_rows_per_chunk)
    B = tp.shape[0]

    # SoftDiceLoss tail: dc = (2tp + smooth) / (2tp + fp + fn + smooth), mean, negate
    dc = (2.0 * tp + smooth) / (2.0 * tp + fp + fn + smooth)   # (B, C)
    dc_loss = -jnp.mean(dc)

    # TopKLoss tail: padded CE entries are -1e30 and can never be selected, so the
    # selection runs directly on the padded map with k derived from the valid count.
    ce_flat = ce_map.reshape(-1)
    num_voxels = B * HW
    kk = max(int(num_voxels * topk_percent / 100.0), 1)
    if approx_topk_recall is not None:
        # O(N) streaming selection for production volumes (slightly approximate).
        topk_vals = jax.lax.approx_max_k(ce_flat, kk, recall_target=approx_topk_recall)[0]
    else:
        # TODO(synk): exact top-k is a sort-class XLA op; for realistic nnU-Net sizes
        # prefer approx_topk_recall~0.95-0.99 or a histogram-threshold pass.
        topk_vals = jax.lax.top_k(ce_flat, kk)[0]
    ce_loss = jnp.mean(topk_vals)

    return ce_loss + dc_loss


def _reference(net_output, target, smooth=1.0, topk_percent=10.0):
    """Pure-JAX reference mirroring the PyTorch module, for a sanity check."""
    x = net_output.astype(jnp.float32)
    B, C, H, W = x.shape
    t = target.reshape(B, 1, H, W).astype(jnp.int32)
    sm = jax.nn.softmax(x, axis=1)
    onehot = (jnp.arange(C).reshape(1, C, 1, 1) == t).astype(jnp.float32)
    tp = jnp.sum(sm * onehot, axis=(2, 3))
    fp = jnp.sum(sm * (1.0 - onehot), axis=(2, 3))
    fn = jnp.sum((1.0 - sm) * onehot, axis=(2, 3))
    dc = (2.0 * tp + smooth) / (2.0 * tp + fp + fn + smooth)
    dc_loss = -jnp.mean(dc)
    logp = jax.nn.log_softmax(x, axis=1)
    ce = -jnp.sum(logp * onehot, axis=1)                       # (B, H, W)
    ce_flat = ce.reshape(-1)
    kk = int(ce_flat.shape[0] * topk_percent / 100.0)
    ce_loss = jnp.mean(jax.lax.top_k(ce_flat, kk)[0])
    return ce_loss + dc_loss


if __name__ == "__main__":
    key = jax.random.PRNGKey(0)
    k1, k2 = jax.random.split(key)

    # Test 1: required small shape (single chunk per image, int32 labels, padded tail)
    B, C, H, W = 2, 4, 16, 16
    x1 = jax.random.normal(k1, (B, C, H, W), dtype=jnp.float32)
    t1 = jax.random.randint(k2, (B, 1, H, W), 0, C, dtype=jnp.int32)
    loss1 = jax.block_until_ready(dc_and_topk_loss(x1, t1))
    ref1 = _reference(x1, t1)
    assert jnp.allclose(loss1, ref1, rtol=1e-4, atol=1e-4), (loss1, ref1)

    # Test 2: multi-chunk accumulation + dual-core split (B odd) + int8 labels + padding
    k3, k4 = jax.random.split(k1)
    B, C, H, W = 1, 3, 112, 112
    x2 = jax.random.normal(k3, (B, C, H, W), dtype=jnp.float32)
    t2 = jax.random.randint(k4, (B, 1, H, W), 0, C, dtype=jnp.int32)
    loss2 = jax.block_until_ready(dc_and_topk_loss(x2, t2, max_rows_per_chunk=32))
    ref2 = _reference(x2, t2)
    assert jnp.allclose(loss2, ref2, rtol=1e-4, atol=1e-4), (loss2, ref2)

    print("KERNEL_OK")
</pallas_src>

<mosaic_0001>
module attributes {stable_mosaic.version = 11 : i64} {
  func.func @_dc_topk_kernel(%arg0: i32, %arg1: i32, %arg2: memref<1x4x8x128xf32, #tpu.memory_space<vmem>>, %arg3: memref<1x8x128xi32, #tpu.memory_space<vmem>>, %arg4: memref<1x12x8x128xf32, #tpu.memory_space<vmem>>, %arg5: memref<1x8x128xf32, #tpu.memory_space<vmem>>) attributes {dimension_semantics = [#tpu.dimension_semantics<parallel>, #tpu.dimension_semantics<arbitrary>], iteration_bounds = array<i64: 2, 1>, scalar_prefetch = 0 : i64, scratch_operands = 0 : i64, tpu.core_type = #tpu.core_type<tc>, window_params = [{transform_indices = @transform_0, window_bounds = array<i64: 1, 4, 8, 128>}, {transform_indices = @transform_1, window_bounds = array<i64: 1, 8, 128>}, {transform_indices = @transform_2, window_bounds = array<i64: 1, 12, 8, 128>}, {transform_indices = @transform_3, window_bounds = array<i64: 1, 8, 128>}]} {
    %c0_i32 = arith.constant 0 : i32
    %0 = arith.cmpi eq, %arg1, %c0_i32 : i32
    %1 = arith.extui %0 : i1 to i32
    %c0_i32_0 = arith.constant 0 : i32
    %2 = arith.cmpi ne, %1, %c0_i32_0 : i32
    scf.if %2 {
      %cst_146 = arith.constant 0.000000e+00 : f32
      %184 = vector.broadcast %cst_146 : f32 to vector<1x12x8x128xf32>
      %c0_147 = arith.constant 0 : index
      %c0_148 = arith.constant 0 : index
      %c0_149 = arith.constant 0 : index
      %c0_150 = arith.constant 0 : index
      %185 = vector.load %arg4[%c0_147, %c0_148, %c0_149, %c0_150] : memref<1x12x8x128xf32, #tpu.memory_space<vmem>>, vector<1x12x8x128xf32>
      tpu.vector_store %arg4[%c0_147, %c0_148, %c0_149, %c0_150], %184 {strides = array<i32>} : memref<1x12x8x128xf32, #tpu.memory_space<vmem>>, vector<1x12x8x128xf32>,
    } else {
    }
    %c0 = arith.constant 0 : index
    %c0_1 = arith.constant 0 : index
    %c0_2 = arith.constant 0 : index
    %3 = vector.load %arg3[%c0, %c0_1, %c0_2] : memref<1x8x128xi32, #tpu.memory_space<vmem>>, vector<1x8x128xi32>
    %4 = vector.shape_cast %3 : vector<1x8x128xi32> to vector<8x128xi32>
    %5 = arith.sitofp %4 : vector<8x128xi32> to vector<8x128xf32>
    %c0_3 = arith.constant 0 : index
    %c0_4 = arith.constant 0 : index
    %c0_5 = arith.constant 0 : index
    %c0_6 = arith.constant 0 : index
    %6 = vector.load %arg2[%c0_3, %c0_4, %c0_5, %c0_6] : memref<1x4x8x128xf32, #tpu.memory_space<vmem>>, vector<1x1x8x128xf32>
    %7 = vector.shape_cast %6 : vector<1x1x8x128xf32> to vector<8x128xf32>
    %c0_7 = arith.constant 0 : index
    %c1 = arith.constant 1 : index
    %c0_8 = arith.constant 0 : index
    %c0_9 = arith.constant 0 : index
    %8 = vector.load %arg2[%c0_7, %c1, %c0_8, %c0_9] : memref<1x4x8x128xf32, #tpu.memory_space<vmem>>, vector<1x1x8x128xf32>
    %9 = vector.shape_cast %8 : vector<1x1x8x128xf32> to vector<8x128xf32>
    %10 = arith.maximumf %7, %9 : vector<8x128xf32>
    %c0_10 = arith.constant 0 : index
    %c2 = arith.constant 2 : index
    %c0_11 = arith.constant 0 : index
    %c0_12 = arith.constant 0 : index
    %11 = vector.load %arg2[%c0_10, %c2, %c0_11, %c0_12] : memref<1x4x8x128xf32, #tpu.memory_space<vmem>>, vector<1x1x8x128xf32>
    %12 = vector.shape_cast %11 : vector<1x1x8x128xf32> to vector<8x128xf32>
    %13 = arith.maximumf %10, %12 : vector<8x128xf32>
    %c0_13 = arith.constant 0 : index
    %c3 = arith.constant 3 : index
    %c0_14 = arith.constant 0 : index
    %c0_15 = arith.constant 0 : index
    %14 = vector.load %arg2[%c0_13, %c3, %c0_14, %c0_15] : memref<1x4x8x128xf32, #tpu.memory_space<vmem>>, vector<1x1x8x128xf32>
    %15 = vector.shape_cast %14 : vector<1x1x8x128xf32> to vector<8x128xf32>
    %16 = arith.maximumf %13, %15 : vector<8x128xf32>
    %cst = arith.constant 0.000000e+00 : f32
    %17 = vector.broadcast %cst : f32 to vector<8x128xf32>
    %c0_16 = arith.constant 0 : index
    %c0_17 = arith.constant 0 : index
    %c0_18 = arith.constant 0 : index
    %c0_19 = arith.constant 0 : index
    %18 = vector.load %arg2[%c0_16, %c0_17, %c0_18, %c0_19] : memref<1x4x8x128xf32, #tpu.memory_space<vmem>>, vector<1x1x8x128xf32>
    %19 = vector.shape_cast %18 : vector<1x1x8x128xf32> to vector<8x128xf32>
    %20 = arith.subf %19, %16 : vector<8x128xf32>
    %21 = math.exp %20 : vector<8x128xf32>
    %cst_20 = arith.constant 0.000000e+00 : f32
    %22 = vector.broadcast %cst_20 : f32 to vector<8x128xf32>
    %23 = arith.cmpf oeq, %5, %22 : vector<8x128xf32>
    %24 = arith.select %23, %19, %17 : vector<8x128xi1>, vector<8x128xf32>
    %c0_21 = arith.constant 0 : index
    %c1_22 = arith.constant 1 : index
    %c0_23 = arith.constant 0 : index
    %c0_24 = arith.constant 0 : index
    %25 = vector.load %arg2[%c0_21, %c1_22, %c0_23, %c0_24] : memref<1x4x8x128xf32, #tpu.memory_space<vmem>>, vector<1x1x8x128xf32>
    %26 = vector.shape_cast %25 : vector<1x1x8x128xf32> to vector<8x128xf32>
    %27 = arith.subf %26, %16 : vector<8x128xf32>
    %28 = math.exp %27 : vector<8x128xf32>
    %29 = arith.addf %21, %28 : vector<8x128xf32>
    %cst_25 = arith.constant 1.000000e+00 : f32
    %30 = vector.broadcast %cst_25 : f32 to vector<8x128xf32>
    %31 = arith.cmpf oeq, %5, %30 : vector<8x128xf32>
    %32 = arith.select %31, %26, %24 : vector<8x128xi1>, vector<8x128xf32>
    %c0_26 = arith.constant 0 : index
    %c2_27 = arith.constant 2 : index
    %c0_28 = arith.constant 0 : index
    %c0_29 = arith.constant 0 : index
    %33 = vector.load %arg2[%c0_26, %c2_27, %c0_28, %c0_29] : memref<1x4x8x128xf32, #tpu.memory_space<vmem>>, vector<1x1x8x128xf32>
    %34 = vector.shape_cast %33 : vector<1x1x8x128xf32> to vector<8x128xf32>
    %35 = arith.subf %34, %16 : vector<8x128xf32>
    %36 = math.exp %35 : vector<8x128xf32>
    %37 = arith.addf %29, %36 : vector<8x128xf32>
    %cst_30 = arith.constant 2.000000e+00 : f32
    %38 = vector.broadcast %cst_30 : f32 to vector<8x128xf32>
    %39 = arith.cmpf oeq, %5, %38 : vector<8x128xf32>
    %40 = arith.select %39, %34, %32 : vector<8x128xi1>, vector<8x128xf32>
    %c0_31 = arith.constant 0 : index
    %c3_32 = arith.constant 3 : index
    %c0_33 = arith.constant 0 : index
    %c0_34 = arith.constant 0 : index
    %41 = vector.load %arg2[%c0_31, %c3_32, %c0_33, %c0_34] : memref<1x4x8x128xf32, #tpu.memory_space<vmem>>, vector<1x1x8x128xf32>
    %42 = vector.shape_cast %41 : vector<1x1x8x128xf32> to vector<8x128xf32>
    %43 = arith.subf %42, %16 : vector<8x128xf32>
    %44 = math.exp %43 : vector<8x128xf32>
    %45 = arith.addf %37, %44 : vector<8x128xf32>
    %cst_35 = arith.constant 3.000000e+00 : f32
    %46 = vector.broadcast %cst_35 : f32 to vector<8x128xf32>
    %47 = arith.cmpf oeq, %5, %46 : vector<8x128xf32>
    %48 = arith.select %47, %42, %40 : vector<8x128xi1>, vector<8x128xf32>
    %49 = math.log %45 : vector<8x128xf32>
    %50 = arith.addf %49, %16 : vector<8x128xf32>
    %51 = arith.subf %50, %48 : vector<8x128xf32>
    %cst_36 = arith.constant 0.000000e+00 : f32
    %52 = vector.broadcast %cst_36 : f32 to vector<8x128xf32>
    %53 = arith.cmpf oge, %5, %52 : vector<8x128xf32>
    %cst_37 = arith.constant -1.000000e+30 : f32
    %54 = vector.broadcast %cst_37 : f32 to vector<8x128xf32>
    %55 = arith.select %53, %51, %54 : vector<8x128xi1>, vector<8x128xf32>
    %c0_38 = arith.constant 0 : index
    %c0_39 = arith.constant 0 : index
    %c0_40 = arith.constant 0 : index
    %56 = vector.load %arg5[%c0_38, %c0_39, %c0_40] : memref<1x8x128xf32, #tpu.memory_space<vmem>>, vector<1x8x128xf32>
    %57 = vector.shape_cast %56 : vector<1x8x128xf32> to vector<8x128xf32>
    %58 = vector.shape_cast %55 : vector<8x128xf32> to vector<1x8x128xf32>
    tpu.vector_store %arg5[%c0_38, %c0_39, %c0_40], %58 {strides = array<i32>} : memref<1x8x128xf32, #tpu.memory_space<vmem>>, vector<1x8x128xf32>,
    %59 = tpu.reciprocal %45 {approx = true} : vector<8x128xf32> -> vector<8x128xf32>
    %60 = arith.mulf %45, %59 : vector<8x128xf32>
    %cst_41 = arith.constant 2.000000e+00 : f32
    %61 = vector.broadcast %cst_41 : f32 to vector<8x128xf32>
    %62 = arith.subf %61, %60 : vector<8x128xf32>
    %63 = arith.mulf %59, %62 : vector<8x128xf32>
    %64 = arith.mulf %21, %63 : vector<8x128xf32>
    %cst_42 = arith.constant 0.000000e+00 : f32
    %65 = vector.broadcast %cst_42 : f32 to vector<8x128xf32>
    %66 = arith.cmpf oeq, %5, %65 : vector<8x128xf32>
    %67 = arith.extui %66 : vector<8x128xi1> to vector<8x128xi32>
    %68 = arith.sitofp %67 : vector<8x128xi32> to vector<8x128xf32>
    %c0_43 = arith.constant 0 : index
    %c0_44 = arith.constant 0 : index
    %c0_45 = arith.constant 0 : index
    %c0_46 = arith.constant 0 : index
    %69 = vector.load %arg4[%c0_43, %c0_44, %c0_45, %c0_46] : memref<1x12x8x128xf32, #tpu.memory_space<vmem>>, vector<1x1x8x128xf32>
    %70 = vector.shape_cast %69 : vector<1x1x8x128xf32> to vector<8x128xf32>
    %71 = arith.mulf %68, %64 : vector<8x128xf32>
    %72 = vector.shape_cast %71 : vector<8x128xf32> to vector<1x8x128xf32>
    %cst_47 = arith.constant dense<0.000000e+00> : vector<8x128xf32>
    %73 = vector.multi_reduction <add>, %72, %cst_47 [0] : vector<1x8x128xf32> to vector<8x128xf32>
    %74 = arith.addf %70, %73 : vector<8x128xf32>
    %c0_48 = arith.constant 0 : index
    %c0_49 = arith.constant 0 : index
    %c0_50 = arith.constant 0 : index
    %c0_51 = arith.constant 0 : index
    %75 = vector.load %arg4[%c0_48, %c0_49, %c0_50, %c0_51] : memref<1x12x8x128xf32, #tpu.memory_space<vmem>>, vector<1x1x8x128xf32>
    %76 = vector.shape_cast %75 : vector<1x1x8x128xf32> to vector<8x128xf32>
    %77 = vector.shape_cast %74 : vector<8x128xf32> to vector<1x1x8x128xf32>
    tpu.vector_store %arg4[%c0_48, %c0_49, %c0_50, %c0_51], %77 {strides = array<i32>} : memref<1x12x8x128xf32, #tpu.memory_space<vmem>>, vector<1x1x8x128xf32>,
    %c0_52 = arith.constant 0 : index
    %c4 = arith.constant 4 : index
    %c0_53 = arith.constant 0 : index
    %c0_54 = arith.constant 0 : index
    %78 = vector.load %arg4[%c0_52, %c4, %c0_53, %c0_54] : memref<1x12x8x128xf32, #tpu.memory_space<vmem>>, vector<1x1x8x128xf32>
    %79 = vector.shape_cast %78 : vector<1x1x8x128xf32> to vector<8x128xf32>
    %80 = vector.shape_cast %64 : vector<8x128xf32> to vector<1x8x128xf32>
    %cst_55 = arith.constant dense<0.000000e+00> : vector<8x128xf32>
    %81 = vector.multi_reduction <add>, %80, %cst_55 [0] : vector<1x8x128xf32> to vector<8x128xf32>
    %82 = arith.addf %79, %81 : vector<8x128xf32>
    %c0_56 = arith.constant 0 : index
    %c4_57 = arith.constant 4 : index
    %c0_58 = arith.constant 0 : index
    %c0_59 = arith.constant 0 : index
    %83 = vector.load %arg4[%c0_56, %c4_57, %c0_58, %c0_59] : memref<1x12x8x128xf32, #tpu.memory_space<vmem>>, vector<1x1x8x128xf32>
    %84 = vector.shape_cast %83 : vector<1x1x8x128xf32> to vector<8x128xf32>
    %85 = vector.shape_cast %82 : vector<8x128xf32> to vector<1x1x8x128xf32>
    tpu.vector_store %arg4[%c0_56, %c4_57, %c0_58, %c0_59], %85 {strides = array<i32>} : memref<1x12x8x128xf32, #tpu.memory_space<vmem>>, vector<1x1x8x128xf32>,
    %c0_60 = arith.constant 0 : index
    %c8 = arith.constant 8 : index
    %c0_61 = arith.constant 0 : index
    %c0_62 = arith.constant 0 : index
    %86 = vector.load %arg4[%c0_60, %c8, %c0_61, %c0_62] : memref<1x12x8x128xf32, #tpu.memory_space<vmem>>, vector<1x1x8x128xf32>
    %87 = vector.shape_cast %86 : vector<1x1x8x128xf32> to vector<8x128xf32>
    %88 = vector.shape_cast %68 : vector<8x128xf32> to vector<1x8x128xf32>
    %cst_63 = arith.constant dense<0.000000e+00> : vector<8x128xf32>
    %89 = vector.multi_reduction <add>, %88, %cst_63 [0] : vector<1x8x128xf32> to vector<8x128xf32>
    %90 = arith.addf %87, %89 : vector<8x128xf32>
    %c0_64 = arith.constant 0 : index
    %c8_65 = arith.constant 8 : index
    %c0_66 = arith.constant 0 : index
    %c0_67 = arith.constant 0 : index
    %91 = vector.load %arg4[%c0_64, %c8_65, %c0_66, %c0_67] : memref<1x12x8x128xf32, #tpu.memory_space<vmem>>, vector<1x1x8x128xf32>
    %92 = vector.shape_cast %91 : vector<1x1x8x128xf32> to vector<8x128xf32>
    %93 = vector.shape_cast %90 : vector<8x128xf32> to vector<1x1x8x128xf32>
    tpu.vector_store %arg4[%c0_64, %c8_65, %c0_66, %c0_67], %93 {strides = array<i32>} : memref<1x12x8x128xf32, #tpu.memory_space<vmem>>, vector<1x1x8x128xf32>,
    %94 = arith.mulf %28, %63 : vector<8x128xf32>
    %cst_68 = arith.constant 1.000000e+00 : f32
    %95 = vector.broadcast %cst_68 : f32 to vector<8x128xf32>
    %96 = arith.cmpf oeq, %5, %95 : vector<8x128xf32>
    %97 = arith.extui %96 : vector<8x128xi1> to vector<8x128xi32>
    %98 = arith.sitofp %97 : vector<8x128xi32> to vector<8x128xf32>
    %c0_69 = arith.constant 0 : index
    %c1_70 = arith.constant 1 : index
    %c0_71 = arith.constant 0 : index
    %c0_72 = arith.constant 0 : index
    %99 = vector.load %arg4[%c0_69, %c1_70, %c0_71, %c0_72] : memref<1x12x8x128xf32, #tpu.memory_space<vmem>>, vector<1x1x8x128xf32>
    %100 = vector.shape_cast %99 : vector<1x1x8x128xf32> to vector<8x128xf32>
    %101 = arith.mulf %98, %94 : vector<8x128xf32>
    %102 = vector.shape_cast %101 : vector<8x128xf32> to vector<1x8x128xf32>
    %cst_73 = arith.constant dense<0.000000e+00> : vector<8x128xf32>
    %103 = vector.multi_reduction <add>, %102, %cst_73 [0] : vector<1x8x128xf32> to vector<8x128xf32>
    %104 = arith.addf %100, %103 : vector<8x128xf32>
    %c0_74 = arith.constant 0 : index
    %c1_75 = arith.constant 1 : index
    %c0_76 = arith.constant 0 : index
    %c0_77 = arith.constant 0 : index
    %105 = vector.load %arg4[%c0_74, %c1_75, %c0_76, %c0_77] : memref<1x12x8x128xf32, #tpu.memory_space<vmem>>, vector<1x1x8x128xf32>
    %106 = vector.shape_cast %105 : vector<1x1x8x128xf32> to vector<8x128xf32>
    %107 = vector.shape_cast %104 : vector<8x128xf32> to vector<1x1x8x128xf32>
    tpu.vector_store %arg4[%c0_74, %c1_75, %c0_76, %c0_77], %107 {strides = array<i32>} : memref<1x12x8x128xf32, #tpu.memory_space<vmem>>, vector<1x1x8x128xf32>,
    %c0_78 = arith.constant 0 : index
    %c5 = arith.constant 5 : index
    %c0_79 = arith.constant 0 : index
    %c0_80 = arith.constant 0 : index
    %108 = vector.load %arg4[%c0_78, %c5, %c0_79, %c0_80] : memref<1x12x8x128xf32, #tpu.memory_space<vmem>>, vector<1x1x8x128xf32>
    %109 = vector.shape_cast %108 : vector<1x1x8x128xf32> to vector<8x128xf32>
    %110 = vector.shape_cast %94 : vector<8x128xf32> to vector<1x8x128xf32>
    %cst_81 = arith.constant dense<0.000000e+00> : vector<8x128xf32>
    %111 = vector.multi_reduction <add>, %110, %cst_81 [0] : vector<1x8x128xf32> to vector<8x128xf32>
    %112 = arith.addf %109, %111 : vector<8x128xf32>
    %c0_82 = arith.constant 0 : index
    %c5_83 = arith.constant 5 : index
    %c0_84 = arith.constant 0 : index
    %c0_85 = arith.constant 0 : index
    %113 = vector.load %arg4[%c0_82, %c5_83, %c0_84, %c0_85] : memref<1x12x8x128xf32, #tpu.memory_space<vmem>>, vector<1x1x8x128xf32>
    %114 = vector.shape_cast %113 : vector<1x1x8x128xf32> to vector<8x128xf32>
    %115 = vector.shape_cast %112 : vector<8x128xf32> to vector<1x1x8x128xf32>
    tpu.vector_store %arg4[%c0_82, %c5_83, %c0_84, %c0_85], %115 {strides = array<i32>} : memref<1x12x8x128xf32, #tpu.memory_space<vmem>>, vector<1x1x8x128xf32>,
    %c0_86 = arith.constant 0 : index
    %c9 = arith.constant 9 : index
    %c0_87 = arith.constant 0 : index
    %c0_88 = arith.constant 0 : index
    %116 = vector.load %arg4[%c0_86, %c9, %c0_87, %c0_88] : memref<1x12x8x128xf32, #tpu.memory_space<vmem>>, vector<1x1x8x128xf32>
    %117 = vector.shape_cast %116 : vector<1x1x8x128xf32> to vector<8x128xf32>
    %118 = vector.shape_cast %98 : vector<8x128xf32> to vector<1x8x128xf32>
    %cst_89 = arith.constant dense<0.000000e+00> : vector<8x128xf32>
    %119 = vector.multi_reduction <add>, %118, %cst_89 [0] : vector<1x8x128xf32> to vector<8x128xf32>
    %120 = arith.addf %117, %119 : vector<8x128xf32>
    %c0_90 = arith.constant 0 : index
    %c9_91 = arith.constant 9 : index
    %c0_92 = arith.constant 0 : index
    %c0_93 = arith.constant 0 : index
    %121 = vector.load %arg4[%c0_90, %c9_91, %c0_92, %c0_93] : memref<1x12x8x128xf32, #tpu.memory_space<vmem>>, vector<1x1x8x128xf32>
    %122 = vector.shape_cast %121 : vector<1x1x8x128xf32> to vector<8x128xf32>
    %123 = vector.shape_cast %120 : vector<8x128xf32> to vector<1x1x8x128xf32>
    tpu.vector_store %arg4[%c0_90, %c9_91, %c0_92, %c0_93], %123 {strides = array<i32>} : memref<1x12x8x128xf32, #tpu.memory_space<vmem>>, vector<1x1x8x128xf32>,
    %124 = arith.mulf %36, %63 : vector<8x128xf32>
    %cst_94 = arith.constant 2.000000e+00 : f32
    %125 = vector.broadcast %cst_94 : f32 to vector<8x128xf32>
    %126 = arith.cmpf oeq, %5, %125 : vector<8x128xf32>
    %127 = arith.extui %126 : vector<8x128xi1> to vector<8x128xi32>
    %128 = arith.sitofp %127 : vector<8x128xi32> to vector<8x128xf32>
    %c0_95 = arith.constant 0 : index
    %c2_96 = arith.constant 2 : index
    %c0_97 = arith.constant 0 : index
    %c0_98 = arith.constant 0 : index
    %129 = vector.load %arg4[%c0_95, %c2_96, %c0_97, %c0_98] : memref<1x12x8x128xf32, #tpu.memory_space<vmem>>, vector<1x1x8x128xf32>
    %130 = vector.shape_cast %129 : vector<1x1x8x128xf32> to vector<8x128xf32>
    %131 = arith.mulf %128, %124 : vector<8x128xf32>
    %132 = vector.shape_cast %131 : vector<8x128xf32> to vector<1x8x128xf32>
    %cst_99 = arith.constant dense<0.000000e+00> : vector<8x128xf32>
    %133 = vector.multi_reduction <add>, %132, %cst_99 [0] : vector<1x8x128xf32> to vector<8x128xf32>
    %134 = arith.addf %130, %133 : vector<8x128xf32>
    %c0_100 = arith.constant 0 : index
    %c2_101 = arith.constant 2 : index
    %c0_102 = arith.constant 0 : index
    %c0_103 = arith.constant 0 : index
    %135 = vector.load %arg4[%c0_100, %c2_101, %c0_102, %c0_103] : memref<1x12x8x128xf32, #tpu.memory_space<vmem>>, vector<1x1x8x128xf32>
    %136 = vector.shape_cast %135 : vector<1x1x8x128xf32> to vector<8x128xf32>
    %137 = vector.shape_cast %134 : vector<8x128xf32> to vector<1x1x8x128xf32>
    tpu.vector_store %arg4[%c0_100, %c2_101, %c0_102, %c0_103], %137 {strides = array<i32>} : memref<1x12x8x128xf32, #tpu.memory_space<vmem>>, vector<1x1x8x128xf32>,
    %c0_104 = arith.constant 0 : index
    %c6 = arith.constant 6 : index
    %c0_105 = arith.constant 0 : index
    %c0_106 = arith.constant 0 : index
    %138 = vector.load %arg4[%c0_104, %c6, %c0_105, %c0_106] : memref<1x12x8x128xf32, #tpu.memory_space<vmem>>, vector<1x1x8x128xf32>
    %139 = vector.shape_cast %138 : vector<1x1x8x128xf32> to vector<8x128xf32>
    %140 = vector.shape_cast %124 : vector<8x128xf32> to vector<1x8x128xf32>
    %cst_107 = arith.constant dense<0.000000e+00> : vector<8x128xf32>
    %141 = vector.multi_reduction <add>, %140, %cst_107 [0] : vector<1x8x128xf32> to vector<8x128xf32>
    %142 = arith.addf %139, %141 : vector<8x128xf32>
    %c0_108 = arith.constant 0 : index
    %c6_109 = arith.constant 6 : index
    %c0_110 = arith.constant 0 : index
    %c0_111 = arith.constant 0 : index
    %143 = vector.load %arg4[%c0_108, %c6_109, %c0_110, %c0_111] : memref<1x12x8x128xf32, #tpu.memory_space<vmem>>, vector<1x1x8x128xf32>
    %144 = vector.shape_cast %143 : vector<1x1x8x128xf32> to vector<8x128xf32>
    %145 = vector.shape_cast %142 : vector<8x128xf32> to vector<1x1x8x128xf32>
    tpu.vector_store %arg4[%c0_108, %c6_109, %c0_110, %c0_111], %145 {strides = array<i32>} : memref<1x12x8x128xf32, #tpu.memory_space<vmem>>, vector<1x1x8x128xf32>,
    %c0_112 = arith.constant 0 : index
    %c10 = arith.constant 10 : index
    %c0_113 = arith.constant 0 : index
    %c0_114 = arith.constant 0 : index
    %146 = vector.load %arg4[%c0_112, %c10, %c0_113, %c0_114] : memref<1x12x8x128xf32, #tpu.memory_space<vmem>>, vector<1x1x8x128xf32>
    %147 = vector.shape_cast %146 : vector<1x1x8x128xf32> to vector<8x128xf32>
    %148 = vector.shape_cast %128 : vector<8x128xf32> to vector<1x8x128xf32>
    %cst_115 = arith.constant dense<0.000000e+00> : vector<8x128xf32>
    %149 = vector.multi_reduction <add>, %148, %cst_115 [0] : vector<1x8x128xf32> to vector<8x128xf32>
    %150 = arith.addf %147, %149 : vector<8x128xf32>
    %c0_116 = arith.constant 0 : index
    %c10_117 = arith.constant 10 : index
    %c0_118 = arith.constant 0 : index
    %c0_119 = arith.constant 0 : index
    %151 = vector.load %arg4[%c0_116, %c10_117, %c0_118, %c0_119] : memref<1x12x8x128xf32, #tpu.memory_space<vmem>>, vector<1x1x8x128xf32>
    %152 = vector.shape_cast %151 : vector<1x1x8x128xf32> to vector<8x128xf32>
    %153 = vector.shape_cast %150 : vector<8x128xf32> to vector<1x1x8x128xf32>
    tpu.vector_store %arg4[%c0_116, %c10_117, %c0_118, %c0_119], %153 {strides = array<i32>} : memref<1x12x8x128xf32, #tpu.memory_space<vmem>>, vector<1x1x8x128xf32>,
    %154 = arith.mulf %44, %63 : vector<8x128xf32>
    %cst_120 = arith.constant 3.000000e+00 : f32
    %155 = vector.broadcast %cst_120 : f32 to vector<8x128xf32>
    %156 = arith.cmpf oeq, %5, %155 : vector<8x128xf32>
    %157 = arith.extui %156 : vector<8x128xi1> to vector<8x128xi32>
    %158 = arith.sitofp %157 : vector<8x128xi32> to vector<8x128xf32>
    %c0_121 = arith.constant 0 : index
    %c3_122 = arith.constant 3 : index
    %c0_123 = arith.constant 0 : index
    %c0_124 = arith.constant 0 : index
    %159 = vector.load %arg4[%c0_121, %c3_122, %c0_123, %c0_124] : memref<1x12x8x128xf32, #tpu.memory_space<vmem>>, vector<1x1x8x128xf32>
    %160 = vector.shape_cast %159 : vector<1x1x8x128xf32> to vector<8x128xf32>
    %161 = arith.mulf %158, %154 : vector<8x128xf32>
    %162 = vector.shape_cast %161 : vector<8x128xf32> to vector<1x8x128xf32>
    %cst_125 = arith.constant dense<0.000000e+00> : vector<8x128xf32>
    %163 = vector.multi_reduction <add>, %162, %cst_125 [0] : vector<1x8x128xf32> to vector<8x128xf32>
    %164 = arith.addf %160, %163 : vector<8x128xf32>
    %c0_126 = arith.constant 0 : index
    %c3_127 = arith.constant 3 : index
    %c0_128 = arith.constant 0 : index
    %c0_129 = arith.constant 0 : index
    %165 = vector.load %arg4[%c0_126, %c3_127, %c0_128, %c0_129] : memref<1x12x8x128xf32, #tpu.memory_space<vmem>>, vector<1x1x8x128xf32>
    %166 = vector.shape_cast %165 : vector<1x1x8x128xf32> to vector<8x128xf32>
    %167 = vector.shape_cast %164 : vector<8x128xf32> to vector<1x1x8x128xf32>
    tpu.vector_store %arg4[%c0_126, %c3_127, %c0_128, %c0_129], %167 {strides = array<i32>} : memref<1x12x8x128xf32, #tpu.memory_space<vmem>>, vector<1x1x8x128xf32>,
    %c0_130 = arith.constant 0 : index
    %c7 = arith.constant 7 : index
    %c0_131 = arith.constant 0 : index
    %c0_132 = arith.constant 0 : index
    %168 = vector.load %arg4[%c0_130, %c7, %c0_131, %c0_132] : memref<1x12x8x128xf32, #tpu.memory_space<vmem>>, vector<1x1x8x128xf32>
    %169 = vector.shape_cast %168 : vector<1x1x8x128xf32> to vector<8x128xf32>
    %170 = vector.shape_cast %154 : vector<8x128xf32> to vector<1x8x128xf32>
    %cst_133 = arith.constant dense<0.000000e+00> : vector<8x128xf32>
    %171 = vector.multi_reduction <add>, %170, %cst_133 [0] : vector<1x8x128xf32> to vector<8x128xf32>
    %172 = arith.addf %169, %171 : vector<8x128xf32>
    %c0_134 = arith.constant 0 : index
    %c7_135 = arith.constant 7 : index
    %c0_136 = arith.constant 0 : index
    %c0_137 = arith.constant 0 : index
    %173 = vector.load %arg4[%c0_134, %c7_135, %c0_136, %c0_137] : memref<1x12x8x128xf32, #tpu.memory_space<vmem>>, vector<1x1x8x128xf32>
    %174 = vector.shape_cast %173 : vector<1x1x8x128xf32> to vector<8x128xf32>
    %175 = vector.shape_cast %172 : vector<8x128xf32> to vector<1x1x8x128xf32>
    tpu.vector_store %arg4[%c0_134, %c7_135, %c0_136, %c0_137], %175 {strides = array<i32>} : memref<1x12x8x128xf32, #tpu.memory_space<vmem>>, vector<1x1x8x128xf32>,
    %c0_138 = arith.constant 0 : index
    %c11 = arith.constant 11 : index
    %c0_139 = arith.constant 0 : index
    %c0_140 = arith.constant 0 : index
    %176 = vector.load %arg4[%c0_138, %c11, %c0_139, %c0_140] : memref<1x12x8x128xf32, #tpu.memory_space<vmem>>, vector<1x1x8x128xf32>
    %177 = vector.shape_cast %176 : vector<1x1x8x128xf32> to vector<8x128xf32>
    %178 = vector.shape_cast %158 : vector<8x128xf32> to vector<1x8x128xf32>
    %cst_141 = arith.constant dense<0.000000e+00> : vector<8x128xf32>
    %179 = vector.multi_reduction <add>, %178, %cst_141 [0] : vector<1x8x128xf32> to vector<8x128xf32>
    %180 = arith.addf %177, %179 : vector<8x128xf32>
    %c0_142 = arith.constant 0 : index
    %c11_143 = arith.constant 11 : index
    %c0_144 = arith.constant 0 : index
    %c0_145 = arith.constant 0 : index
    %181 = vector.load %arg4[%c0_142, %c11_143, %c0_144, %c0_145] : memref<1x12x8x128xf32, #tpu.memory_space<vmem>>, vector<1x1x8x128xf32>
    %182 = vector.shape_cast %181 : vector<1x1x8x128xf32> to vector<8x128xf32>
    %183 = vector.shape_cast %180 : vector<8x128xf32> to vector<1x1x8x128xf32>
    tpu.vector_store %arg4[%c0_142, %c11_143, %c0_144, %c0_145], %183 {strides = array<i32>} : memref<1x12x8x128xf32, #tpu.memory_space<vmem>>, vector<1x1x8x128xf32>,
    return
  }
  func.func @transform_0(%arg0: i32, %arg1: i32) -> (i32, i32, i32, i32) {
    %c0_i32 = arith.constant 0 : i32
    %c0_i32_0 = arith.constant 0 : i32
    %c0_i32_1 = arith.constant 0 : i32
    return %arg0, %c0_i32, %arg1, %c0_i32_0 : i32, i32, i32, i32
  }
  func.func @transform_1(%arg0: i32, %arg1: i32) -> (i32, i32, i32) {
    %c0_i32 = arith.constant 0 : i32
    %c0_i32_0 = arith.constant 0 : i32
    return %arg0, %arg1, %c0_i32 : i32, i32, i32
  }
  func.func @transform_2(%arg0: i32, %arg1: i32) -> (i32, i32, i32, i32) {
    %c0_i32 = arith.constant 0 : i32
    %c0_i32_0 = arith.constant 0 : i32
    %c0_i32_1 = arith.constant 0 : i32
    %c0_i32_2 = arith.constant 0 : i32
    return %arg0, %c0_i32, %c0_i32_0, %c0_i32_1 : i32, i32, i32, i32
  }
  func.func @transform_3(%arg0: i32, %arg1: i32) -> (i32, i32, i32) {
    %c0_i32 = arith.constant 0 : i32
    %c0_i32_0 = arith.constant 0 : i32
    return %arg0, %arg1, %c0_i32 : i32, i32, i32
  }
}

</mosaic_0001>

<bundles_post_ra>
// kernel: tpu_custom_call.1
= control target key start
LH: loop header
LB: loop body
LE: loop exit
PB: predicated region body
PF: predicated region fallthrough
CT: control target
= control target key end

     0   :  { %9 = vsyncpa [#allocation3], 0  ;;  %s1210_s0 = inlined_call_operand.hbm [shape: f32[2,4,8,128], index: 0, kind: input, shape index: {}]   ;;  %s1211_s1 = inlined_call_operand.hbm [shape: s32[2,8,128], index: 1, kind: input, shape index: {}]   ;;  %s1212_s2 = inlined_call_operand.hbm [shape: f32[2,12,8,128], index: 2, kind: output, shape index: {0}]   ;;  %s1213_s3 = inlined_call_operand.hbm [shape: f32[2,8,128], index: 3, kind: output, shape index: {1}]  }
   0x1   :  { %11 = vsyncpa [#allocation3 + $0x1], 0 }
   0x2   :  { %12 = vsyncpa [#allocation6], 0 }
   0x3   :  { %14 = vsyncpa [#allocation6 + $0x1], 0 }
   0x4   :  { %15 = vsyncpa [#allocation4], 0 }
   0x5   :  { %17 = vsyncpa [#allocation4 + $0x1], 0 }
   0x6   :  { %18 = vsyncpa [#allocation9], 0 }
   0x7   :  { %20 = vsyncpa [#allocation9 + $0x1], 0  ;;  %s915_s12 = smov 0   ;;  %s917_s13 = smov 0  }
   0x8   :  { %s919_s14 = smov 0   ;;  %s921_s15 = smov 0  }
   0x9   :  { %s923_s16 = smov 0   ;;  %s925_s17 = smov 0  }
   0xa LB: > { %s567_s18 = sadd.s32 4294967295, %s884_s17   ;;  %s568_s19 = sadd.s32 4294967294, %s884_s17   ;;  %s884_s17 = sphi %s925_s17, %s26_s17   ;;  %s880_s16 = sphi %s923_s16, %s1232_s16   ;;  %s876_s15 = sphi %s921_s15, %s1231_s15   ;;  %s872_s14 = sphi %s919_s14, %s1230_s14   ;;  %s868_s13 = sphi %s917_s13, %s1229_s13   ;;  %s864_s12 = sphi %s915_s12, %s1228_s12  }
   0xb   : > { %s38_s20 = sadd.s32 1, %s880_s16  ;;  %s47_s21 = sadd.s32 1, %s872_s14 }
   0xc   : > { %p40_p0 = scmp.ge.s32.totalorder %s38_s20, 2  ;;  %p54_p1 = scmp.ne.s32.totalorder %s872_s14, %s868_s13 }
   0xd   : > { %p55_p2 = scmp.eq.s32.totalorder %s884_s17, 0  ;;  %p60_p3 = scmp.ne.s32.totalorder %s868_s13, %s864_s12 }
   0xe   : > { %s1234_s20 = smov (%p40_p0, %s38_s20), 0  ;;  %p61_p5 = scmp.eq.s32.totalorder %s567_s18, 0 }
   0xf   : > { %p956_p4 = por %p55_p2, %p54_p1  ;;  %s42_s23 = ssub.s32 %s880_s16, %s1234_s20 }
  0x10   : > { %p112_p6 = scmp.eq.s32.totalorder %s567_s18, 1  ;;  %p45_p7 = scmp.eq.s32.totalorder %s42_s23, 0 }
  0x11   : > { %p962_p8 = por %p61_p5, %p60_p3  ;;  %p118_p10 = scmp.eq.s32.totalorder %s568_s19, 1 }
  0x12   : > { %p966_p9 = por %p112_p6, %p54_p1  ;;  %p639_p13 = scmp.lt.s32.totalorder %s884_s17, 2 }
  0x13   : > { %s1217_s24 = scalar_select %p962_p8, 1, 0 }
  0x14   : > { %s1218_s25 = scalar_select %p966_p9, 1, 0 }
  0x15   : > { %s971_s26 = scalar_select %p45_p7, %s872_s14, %s47_s21  }
  0x16   : > { %p973_p11 = por %p118_p10, %p60_p3  ;;  %s980_s28 = sand.u32 1, %s872_s14  }
  0x17   : > { %s571_s29 = sshll.u32 %s980_s28, 5  ;;  %s614_s30 = sshll.u32 %s880_s16, 9 }
  0x18   : > { %s1219_s27 = scalar_select %p973_p11, 1, 0 }
  0x19   : > { %s987_s6 = scalar_lea.hbm %s1210_s0, %s614_s30  ;;  %s170_s7 = scalar_lea.vmem [#allocation2], %s571_s29 }
  0x1a   : > { %s178_s8 = sshll.u32 %s170_s7, 4  ;;  %p993_p0 = pnand %p639_p13, %p956_p4  ;;  %s989_s8 = int_to_ptr.vmem [resolvable:$true] %s178_s8 }
  0x1b   : > { %s167_s10 = scalar_lea.sflag [#allocation3], %s980_s28  ;;  %s706_s11 = scalar_lea.hbm %s987_s6, 512 }
  0x1c   : > { %p707_p2 = scmp.ne.s32.totalorder %s987_s6, %s706_s11  ;;  %p708_p3 = pneg %p993_p0 }
  0x1d   : > { %s711_s21 = scalar_lea.hbm %s1210_s0, 1024  ;;  %p712_p4 = scmp.lt.u32.totalorder %s987_s6, %s1210_s0 }
  0x1e   : > { %p709_p5 = pnand %p708_p3, %p707_p2  ;;  %p713_p7 = scmp.lt.u32.totalorder %s711_s21, %s706_s11 }
  0x1f   : > { %p715_p13 = scmp.lt.u32.totalorder %s706_s11, %s987_s6 }
  0x20   : > { %p710_p6 = pneg %p709_p5  ;;  %p714_p10 = por %p713_p7, %p712_p4 }
  0x22   : > { %p716_p12 = por %p715_p13, %p714_p10 }
  0x24   : > { %p717_p1 = pnand %p716_p12, %p710_p6 }
  0x26   : > { %720 = shalt.err (!%p717_p1)
}
  0x27   : > { %s721_s29 = scalar_lea.vmem %s989_s8, 512  ;;  %s886_s30 = smov [#allocation2]  }
  0x28   : > { %p722_p2 = scmp.ne.s32.totalorder %s989_s8, %s721_s29  ;;  %s726_s4 = sshll.u32 %s886_s30, 4  ;;  %s727_s4 = int_to_ptr.vmem [resolvable:$false] %s726_s4 }
  0x29   : > { %s728_s5 = scalar_lea.vmem %s727_s4, 1024  ;;  %p729_p9 = scmp.lt.s32.totalorder %s989_s8, %s727_s4 }
  0x2a   : > { %p724_p5 = pnand %p722_p2, %p708_p3  ;;  %p730_p4 = scmp.lt.s32.totalorder %s728_s5, %s721_s29 }
  0x2c   : > { %p725_p11 = pneg %p724_p5  ;;  %p731_p7 = por %p730_p4, %p729_p9 }
  0x2e   : > { %p732_p10 = pnand %p731_p7, %p725_p11 }
  0x30   : > { %735 = shalt.err (!%p732_p10)
}
  0x31   : > { %s887_s7 = smov 128   ;;  %s888_s11 = smov 8  }
  0x32   : > { %628 = dma.hbm_to_vmem [thread:$0]  (!%p993_p0), %s987_s6, 512, %s989_s8, %s167_s10, %s887_s7, %s887_s7, %s888_s11  }
  0x33   : > { %p205_p12 = scmp.lt.s32.totalorder %s884_s17, 3  ;;  %s574_s18 = sshll.u32 %s980_s28, 3 }
  0x34   : > { %s575_s19 = sshll.u32 %s880_s16, 7  ;;  %p1221_p9 = scmp.ge.s32.totalorder %s884_s17, 1 }
  0x35   : > { %s1038_s29 = scalar_lea.hbm %s1211_s1, %s575_s19  ;;  %s192_s30 = scalar_lea.vmem [#allocation5], %s574_s18 }
  0x36   : > { %p1031_p11 = pnand %p1221_p9, %p205_p12  ;;  %s200_s4 = sshll.u32 %s192_s30, 4  ;;  %s201_s4 = int_to_ptr.vmem [resolvable:$true] %s200_s4 }
  0x37   : > { %s189_s6 = scalar_lea.sflag [#allocation6], %s980_s28  ;;  %s736_s8 = scalar_lea.hbm %s1038_s29, 128 }
  0x38   : > { %s1222_s21 = scalar_select %p1031_p11, 1, 0 }
  0x39   : > { %p737_p1 = scmp.ne.s32.totalorder %s1038_s29, %s736_s8  ;;  %s741_s7 = scalar_lea.hbm %s1211_s1, 256 }
  0x3a   : > { %p742_p2 = scmp.lt.u32.totalorder %s1038_s29, %s1211_s1  ;;  %p743_p5 = scmp.lt.u32.totalorder %s741_s7, %s736_s8 }
  0x3b   : > { %p739_p6 = pnand %p737_p1, %p708_p3  ;;  %p745_p7 = scmp.lt.u32.totalorder %s736_s8, %s1038_s29 }
  0x3c   : > { %p744_p4 = por %p743_p5, %p742_p2 }
  0x3d   : > { %p740_p13 = pneg %p739_p6 }
  0x3e   : > { %p746_p10 = por %p745_p7, %p744_p4 }
  0x40   : > { %p747_p12 = pnand %p746_p10, %p740_p13 }
  0x42   : > { %750 = shalt.err (!%p747_p12)
}
  0x43   : > { %s751_s28 = scalar_lea.vmem %s201_s4, 128  ;;  %s889_s18 = smov [#allocation5]  }
  0x44   : > { %p752_p9 = scmp.ne.s32.totalorder %s201_s4, %s751_s28  ;;  %s756_s22 = sshll.u32 %s889_s18, 4  ;;  %s757_s22 = int_to_ptr.vmem [resolvable:$false] %s756_s22 }
  0x45   : > { %s758_s23 = scalar_lea.vmem %s757_s22, 256  ;;  %p759_p8 = scmp.lt.s32.totalorder %s201_s4, %s757_s22 }
  0x46   : > { %p754_p1 = pnand %p752_p9, %p708_p3  ;;  %p760_p11 = scmp.lt.s32.totalorder %s758_s23, %s751_s28 }
  0x48   : > { %p755_p6 = pneg %p754_p1  ;;  %p761_p2 = por %p760_p11, %p759_p8 }
  0x4a   : > { %p762_p5 = pnand %p761_p2, %p755_p6 }
  0x4c   : > { %765 = shalt.err (!%p762_p5)
}
  0x4d   : > { %631 = dma.hbm_to_vmem [thread:$0]  (!%p993_p0), %s1038_s29, 128, %s201_s4, %s189_s6  }
  0x4e   : > { %p1223_p13 = scmp.ne.s32.totalorder %s1222_s21, 0 }
  0x4f   : > { %s1063_s30 = sand.u32 (!%p1223_p13), 1, %s868_s13   ;;  %p1224_p3 = scmp.ne.s32.totalorder (!%p1223_p13), %s1217_s24, 0 }
  0x50   : > { %209 = sbr.rel (%p1223_p13) target bundleno = 177 (0xb1), region = 28  ;;  %s577_s8 = sshll.u32 (!%p1223_p13), %s1063_s30, 5 }
  0x51   : > { %s212_s10 = scalar_lea.sflag (!%p1223_p13), [#allocation3], %s1063_s30  ;;  %s215_s5 = scalar_lea.vmem (!%p1223_p13), [#allocation2], %s577_s8 }
  0x57   : > { %847 = dma.done.wait (%p1224_p3), %s212_s10, 512  }
  0x58   : > { %849 = vsyncadd (%p1224_p3), %s212_s10, 4294966784  ;;  %s578_s9 = sshll.u32 %s1063_s30, 3  ;;  %s221_s21 = scalar_lea.sflag [#allocation6], %s1063_s30 }
  0x59   : > { %s224_s29 = scalar_lea.vmem [#allocation5], %s578_s9 }
  0x5a   : > { %851 = dma.done.wait (%p1224_p3), %s221_s21, 128  }
  0x5b   : > { %853 = vsyncadd (%p1224_p3), %s221_s21, 4294967168  ;;  %s615_s4 = smul.u32 96, %s1063_s30  ;;  %v273_v0 = vld [vmem:[%s224_s29] sm:$0xff]  ;;  %v581_v5 = vld [vmem:[%s215_s5 + $0x10] sm:$0xff]  ;;  %v890_v8 = vmov 0.0   ;;  %s256_s6 = scalar_lea.vmem [#allocation8], %s578_s9 }
  0x5c   : > { %v275_v1 = vld [vmem:[%s215_s5] sm:$0xff]  ;;  %v580_v2 = vld [vmem:[%s215_s5 + $0x8] sm:$0xff]  ;;  %v274_v3 = vcvt.s32.f32 %v273_v0  ;;  %v582_v6 = vld [vmem:[%s215_s5 + $0x18] sm:$0xff]  ;;  %s430_s7 = sshll.u32 %s256_s6, 4  ;;  %s611_s11 = sshll.u32 %s876_s15, 7  ;;  %s1109_s7 = int_to_ptr.vmem [resolvable:$true] %s430_s7 }
  0x5d   : > { %v278_v4 = vmax.f32 %v275_v1, %v580_v2  ;;  %s1092_s24 = scalar_lea.vmem [#allocation7], %s615_s4  ;;  %s1114_s18 = scalar_lea.hbm %s1213_s3, %s611_s11 }
  0x5e   : > { %vm288_vm0 = vcmp.eq.f32.partialorder %v274_v3, 0.0  ;;  %vm294_vm1 = vcmp.eq.f32.partialorder %v274_v3, 1.0  ;;  %vm300_vm2 = vcmp.eq.f32.partialorder %v274_v3, 2.0  ;;  %vm306_vm3 = vcmp.eq.f32.partialorder %v274_v3, 3.0  ;;  %s616_s22 = smul.u32 1536, %s876_s15  ;;  %s413_s23 = sshll.u32 %s1092_s24, 4  ;;  %s1148_s23 = int_to_ptr.vmem [resolvable:$true] %s413_s23 }
  0x5f   : > { %v281_v7 = vmax.f32 %v278_v4, %v581_v5  ;;  %v1081_v9 = vsel %vm288_vm0, 1.0, %v890_v8  ;;  %v1084_v11 = vsel %vm306_vm3, 1.0, %v890_v8  ;;  %v1087_v12 = vsel %vm294_vm1, 1.0, %v890_v8  ;;  %s400_s8 = scalar_lea.sflag [#allocation9], %s1063_s30  ;;  %s766_s10 = scalar_lea.vmem %s1109_s7, 128 }
  0x60   : > { %v1090_v13 = vsel %vm300_vm2, 1.0, %v890_v8  ;;  %587 = vst [vmem:[%s1092_s24 + $0x40] sm:$0xff] %v1081_v9  ;;  %608 = vst [vmem:[%s1092_s24 + $0x58] sm:$0xff] %v1084_v11  ;;  %v289_v29 = vsel %vm288_vm0, %v275_v1, 0.0  ;;  %vm312_vm4 = vcmp.ge.f32.partialorder %v274_v3, 0.0  ;;  %p767_p8 = scmp.ne.s32.totalorder %s1109_s7, %s766_s10  ;;  %p1225_p0 = scmp.ne.s32.totalorder %s1218_s25, 0 }
  0x61   : > { %v284_v10 = vmax.f32 %v281_v7, %v582_v6  ;;  %594 = vst [vmem:[%s1092_s24 + $0x48] sm:$0xff] %v1087_v12  ;;  %601 = vst [vmem:[%s1092_s24 + $0x50] sm:$0xff] %v1090_v13  ;;  %v295_v30 = vsel %vm294_vm1, %v580_v2, %v289_v29  ;;  %s891_s5 = smov [#allocation8]  }
  0x62   : > { %v301_v31 = vsel %vm300_vm2, %v581_v5, %v295_v30  ;;  %p768_p11 = pnand %p767_p8, %p1225_p0  ;;  %s770_s9 = sshll.u32 %s891_s5, 4  ;;  %s771_s9 = int_to_ptr.vmem [resolvable:$false] %s770_s9 }
  0x63   : > { %v285_v14 = vsub.f32 %v275_v1, %v284_v10  ;;  %v290_v15 = vsub.f32 %v580_v2, %v284_v10  ;;  %v296_v16 = vsub.f32 %v581_v5, %v284_v10  ;;  %v302_v17 = vsub.f32 %v582_v6, %v284_v10  ;;  %s772_s21 = scalar_lea.vmem %s771_s9, 256  ;;  %p773_p7 = scmp.lt.s32.totalorder %s1109_s7, %s771_s9 }
  0x64   : > { %v307_v35 = vsel %vm306_vm3, %v582_v6, %v301_v31  ;;  %p769_p4 = pneg %p768_p11  ;;  %p774_p10 = scmp.lt.s32.totalorder %s772_s21, %s766_s10 }
  0x65   : > { %v286_v18 = vmul.f32 1.442695, %v285_v14  ;;  %v291_v19 = vmul.f32 1.442695, %v290_v15  ;;  %v297_v20 = vmul.f32 1.442695, %v296_v16 }
  0x66   : > { %v303_v21 = vmul.f32 1.442695, %v302_v17  ;;  %p775_p12 = por %p774_p10, %p773_p7 }
  0x67   : > { %694 = vpow2.f32 %v286_v18 }
  0x68   : > { %696 = vpow2.f32 %v291_v19  ;;  %p776_p9 = pnand %p775_p12, %p769_p4 }
  0x69   : > { %698 = vpow2.f32 %v297_v20 }
  0x6a   : > { %700 = vpow2.f32 %v303_v21 }
  0x71   : > { %v695_v22 = vpop.eup %694 }
  0x72   : > { %v697_v23 = vpop.eup %696 }
  0x73   : > { %v699_v24 = vpop.eup %698  ;;  %v293_v25 = vadd.f32 %v697_v23, %v695_v22 }
  0x74   : > { %v701_v26 = vpop.eup %700 }
  0x75   : > { %v299_v27 = vadd.f32 %v699_v24, %v293_v25 }
  0x77   : > { %v305_v28 = vadd.f32 %v701_v26, %v299_v27 }
  0x79   : > { %702 = vlog2.f32 %v305_v28 }
  0x7a   : > { %704 = vrcp.f32 %v305_v28 }
  0x83   : > { %v703_v32 = vpop.eup %702 }
  0x84   : > { %v705_v33 = vpop.eup %704  ;;  %v309_v34 = vmul.f32 0.6931472, %v703_v32 }
  0x85   : > { %v316_v36 = vmul.f32 %v705_v33, %v305_v28 }
  0x86   : > { %v310_v37 = vadd.f32 %v309_v34, %v284_v10 }
  0x87   : > { %v317_v38 = vsub.f32 2.0, %v316_v36 }
  0x88   : > { %v311_v39 = vsub.f32 %v310_v37, %v307_v35 }
  0x89   : > { %v318_v40 = vmul.f32 %v705_v33, %v317_v38 }
  0x8a   : > { %v313_v41 = vsel %vm312_vm4, %v311_v39, -1e+30 }
  0x8b   : > { %314 = vst [vmem:[%s256_s6] sm:$0xff] %v313_v41  ;;  %v319_v42 = vmul.f32 %v695_v22, %v318_v40  ;;  %v337_v43 = vmul.f32 %v697_v23, %v318_v40  ;;  %v356_v44 = vmul.f32 %v699_v24, %v318_v40  ;;  %v375_v45 = vmul.f32 %v701_v26, %v318_v40 }
  0x8c   : > { %779 = shalt.err (!%p776_p9)
}
  0x8d   : > { %s780_s29 = scalar_lea.hbm %s1114_s18, 128  ;;  %s784_s11 = scalar_lea.hbm %s1213_s3, 256 }
  0x8e   : > { %p781_p1 = scmp.ne.s32.totalorder %s1114_s18, %s780_s29  ;;  %p785_p5 = scmp.lt.u32.totalorder %s1114_s18, %s1213_s3 }
  0x8f   : > { %p786_p13 = scmp.lt.u32.totalorder %s784_s11, %s780_s29  ;;  %p788_p8 = scmp.lt.u32.totalorder %s780_s29, %s1114_s18 }
  0x90   : > { %p782_p6 = pnand %p781_p1, %p1225_p0 }
  0x91   : > { %p787_p3 = por %p786_p13, %p785_p5 }
  0x92   : > { %p783_p2 = pneg %p782_p6 }
  0x93   : > { %p789_p11 = por %p788_p8, %p787_p3 }
  0x95   : > { %p790_p4 = pnand %p789_p11, %p783_p2 }
  0x97   : > { %793 = shalt.err (!%p790_p4)
}
  0x98   : > { %622 = dma.vmem_to_hbm [thread:$0]  (%p1225_p0), %s1109_s7, 128, %s1114_s18, %s400_s8   ;;  %v323_v46 = vmul.f32 %v1081_v9, %v319_v42  ;;  %v342_v47 = vmul.f32 %v1087_v12, %v337_v43  ;;  %v361_v48 = vmul.f32 %v1090_v13, %v356_v44  ;;  %v380_v49 = vmul.f32 %v1084_v11, %v375_v45  ;;  %585 = vst [vmem:[%s1092_s24 + $0x20] sm:$0xff] %v319_v42 }
  0x99   : > { %592 = vst [vmem:[%s1092_s24 + $0x28] sm:$0xff] %v337_v43  ;;  %599 = vst [vmem:[%s1092_s24 + $0x30] sm:$0xff] %v356_v44  ;;  %s1157_s8 = scalar_lea.hbm %s1212_s2, %s616_s22  ;;  %s395_s10 = scalar_lea.sflag [#allocation4], %s1063_s30 }
  0x9a   : > { %606 = vst [vmem:[%s1092_s24 + $0x38] sm:$0xff] %v375_v45  ;;  %326 = vst [vmem:[%s1092_s24] sm:$0xff] %v323_v46  ;;  %s794_s5 = scalar_lea.vmem %s1148_s23, 1536  ;;  %s892_s9 = smov [#allocation7]  }
  0x9b   : > { %590 = vst [vmem:[%s1092_s24 + $0x8] sm:$0xff] %v342_v47  ;;  %597 = vst [vmem:[%s1092_s24 + $0x10] sm:$0xff] %v361_v48  ;;  %p795_p7 = scmp.ne.s32.totalorder %s1148_s23, %s794_s5  ;;  %s798_s21 = sshll.u32 %s892_s9, 4  ;;  %s799_s21 = int_to_ptr.vmem [resolvable:$false] %s798_s21 }
  0x9c   : > { %604 = vst [vmem:[%s1092_s24 + $0x18] sm:$0xff] %v380_v49  ;;  %s800_s29 = scalar_lea.vmem %s799_s21, 3072  ;;  %p801_p9 = scmp.lt.s32.totalorder %s1148_s23, %s799_s21 }
  0x9d   : > { %p796_p10 = pnand %p795_p7, %p1225_p0  ;;  %p802_p1 = scmp.lt.s32.totalorder %s800_s29, %s794_s5 }
  0x9f   : > { %p797_p12 = pneg %p796_p10  ;;  %p803_p6 = por %p802_p1, %p801_p9 }
  0xa1   : > { %p804_p2 = pnand %p803_p6, %p797_p12 }
  0xa3   : > { %807 = shalt.err (!%p804_p2)
}
  0xa4   : > { %s808_s15 = scalar_lea.hbm %s1157_s8, 1536  ;;  %s812_s4 = scalar_lea.hbm %s1212_s2, 3072 }
  0xa5   : > { %p809_p5 = scmp.ne.s32.totalorder %s1157_s8, %s808_s15  ;;  %p813_p8 = scmp.lt.u32.totalorder %s1157_s8, %s1212_s2 }
  0xa6   : > { %p814_p11 = scmp.lt.u32.totalorder %s812_s4, %s808_s15  ;;  %p816_p7 = scmp.lt.u32.totalorder %s808_s15, %s1157_s8 }
  0xa7   : > { %p810_p13 = pnand %p809_p5, %p1225_p0 }
  0xa8   : > { %p815_p4 = por %p814_p11, %p813_p8 }
  0xa9   : > { %p811_p3 = pneg %p810_p13 }
  0xaa   : > { %p817_p10 = por %p816_p7, %p815_p4 }
  0xac   : > { %p818_p12 = pnand %p817_p10, %p811_p3 }
  0xae   : > { %821 = shalt.err (!%p818_p12)
}
  0xaf   : > { %s893_s19 = smov 128   ;;  %s894_s28 = smov 8  }
  0xb0   : > { %621 = dma.vmem_to_hbm [thread:$0]  (%p1225_p0), %s1148_s23, 1536, %s1157_s8, %s395_s10, %s893_s19, %s893_s19, %s894_s28  }
  0xb1 PF: > { %s442_s7 = sand.u32 1, %s864_s12   ;;  %p1226_p9 = scmp.ne.s32.totalorder %s1219_s27, 0 }
  0xb2   : > { %p1227_p1 = scmp.ge.s32.totalorder %s884_s17, 2  ;;  %s443_s18 = scalar_lea.sflag [#allocation4], %s442_s7 }
  0xb4   : > { %p633_p6 = pnand %p1227_p1, %p1226_p9 }
  0xb6   : > { %855 = dma.done.wait (!%p633_p6), %s443_s18, 1536  }
  0xb7   : > { %857 = vsyncadd (!%p633_p6), %s443_s18, 4294965760  ;;  %s452_s5 = scalar_lea.sflag [#allocation9], %s442_s7 }
  0xb8   : > { %859 = dma.done.wait (!%p633_p6), %s452_s5, 128  }
  0xb9   : > { %861 = vsyncadd (!%p633_p6), %s452_s5, 4294967168  ;;  %s26_s17 = sadd.s32 1, %s884_s17   ;;  %s1228_s12 = smov %s868_s13 }
  0xba   : > { %p23_p2 = scmp.ge.s32.totalorder %s26_s17, 4   ;;  %s1229_s13 = smov %s872_s14 }
  0xbb   : > { %s1230_s14 = smov %s971_s26  ;;  %s1231_s15 = smov %s880_s16 }
  0xbc   : > { %s1232_s16 = smov %s1234_s20  ;;  %25 = sbr.rel (!%p23_p2) target bundleno = 10 (0xa), region = 121 }
  0xc3   :  { %457 = vsyncpa [#allocation3], 1 }
  0xc4   :  { %459 = vsyncpa [#allocation3 + $0x1], 1 }
  0xc5   :  { %460 = vsyncpa [#allocation6], 1 }
  0xc6   :  { %462 = vsyncpa [#allocation6 + $0x1], 1 }
  0xc7   :  { %463 = vsyncpa [#allocation4], 1 }
  0xc8   :  { %465 = vsyncpa [#allocation4 + $0x1], 1 }
  0xc9   :  { %466 = vsyncpa [#allocation9], 1 }
  0xca   :  { %468 = vsyncpa [#allocation9 + $0x1], 1 }

</bundles_post_ra>
